<compile_context>
chip_gen: v5e
topology: v5e:2x2
jax: 0.10.0
libtpu: 0.0.40
codegen_flags: <defaults>
</compile_context>

<pallas_src>
import math
from functools import partial

import jax
import jax.numpy as jnp
from jax.experimental import pallas as pl
from jax.experimental.pallas import tpu as pltpu

_LANE = 128
_SUBLANE_BF16 = 16  # bf16 packs two rows per sublane -> pad M to 16


def _round_up(x: int, m: int) -> int:
    return ((x + m - 1) // m) * m


def _padded_kn(K: int, N: int):
    """MXU-aligned (256) padding for the contraction and output dims.

    K is padded up to the preferred tk (never shrink tk for awkward K):
    if a single <=1024 tile covers it, pad to a multiple of 256; otherwise
    pad to a multiple of 512 so tk=512 divides it exactly.
    """
    k256 = _round_up(K, 256)
    K_pad = k256 if k256 <= 1024 else _round_up(K, 512)
    N_pad = _round_up(N, 256)
    return K_pad, N_pad


# ---------------------------------------------------------------------------
# Pallas kernels
# ---------------------------------------------------------------------------
def _expert_matmul_k1_kernel(x_ref, w_ref, b_ref, o_ref):
    """Single-K-tile fast path: no accumulator scratch, no pl.when branches."""
    acc = jnp.dot(x_ref[...], w_ref[...], preferred_element_type=jnp.float32)
    o_ref[...] = (acc + b_ref[...]).astype(o_ref.dtype)


def _expert_matmul_kernel(x_ref, w_ref, b_ref, o_ref, acc_ref):
    """Multi-K-tile path: f32 VMEM accumulator, bias add + cast in epilogue."""
    k = pl.program_id(3)

    @pl.when(k == 0)
    def _init():
        acc_ref[...] = jnp.zeros_like(acc_ref)

    acc_ref[...] += jnp.dot(
        x_ref[...], w_ref[...], preferred_element_type=jnp.float32
    )

    @pl.when(k == pl.num_programs(3) - 1)
    def _finalize():
        o_ref[...] = (acc_ref[...] + b_ref[...]).astype(o_ref.dtype)


# ---------------------------------------------------------------------------
# pallas_call wrapper: batched (per-expert) tiled matmul + bias.
# ---------------------------------------------------------------------------
def _batched_expert_forward(x, w, b, *, tm, tn, tk, out_dtype):
    """x: (E, M, K) bf16, w: (E, K, N) bf16, b: (E, 1, N) f32 -> (E, M, N)."""
    E, M, K = x.shape
    N = w.shape[-1]
    gm, gn, gk = M // tm, N // tn, K // tk
    out_itemsize = jnp.dtype(out_dtype).itemsize

    flops = 2 * E * M * K * N
    # Account for re-reads: x is streamed once per N tile, W once per M tile.
    bytes_accessed = (
        gn * x.size * x.dtype.itemsize
        + gm * w.size * w.dtype.itemsize
        + gm * gk * b.size * b.dtype.itemsize
        + E * M * N * out_itemsize
    )
    cost = pl.CostEstimate(
        flops=flops, transcendentals=0, bytes_accessed=bytes_accessed
    )

    # Double-buffered in/out tiles + f32 accumulator; cap at 48 MiB so the
    # budget fits v7x's 64 MiB physical VMEM as well as v5e/v6e's 128 MiB.
    step_bytes = (
        2 * (tm * tk * 2 + tk * tn * 2 + tn * 4 + tm * tn * out_itemsize)
        + tm * tn * 4
    )
    vmem_limit = int(min(max(3 * step_bytes, 32 << 20), 48 << 20))

    if gk == 1:
        # K collapsed into one tile: scratch-free kernel, 3-D fully parallel grid.
        return pl.pallas_call(
            _expert_matmul_k1_kernel,
            out_shape=jax.ShapeDtypeStruct((E, M, N), out_dtype),
            grid_spec=pltpu.PrefetchScalarGridSpec(
                num_scalar_prefetch=0,
                grid=(E, gm, gn),
                in_specs=[
                    pl.BlockSpec((None, tm, tk), lambda e, i, j: (e, i, 0)),
                    pl.BlockSpec((None, tk, tn), lambda e, i, j: (e, 0, j)),
                    pl.BlockSpec((None, 1, tn), lambda e, i, j: (e, 0, j)),
                ],
                out_specs=pl.BlockSpec(
                    (None, tm, tn), lambda e, i, j: (e, i, j)
                ),
            ),
            compiler_params=pltpu.CompilerParams(
                dimension_semantics=("parallel", "parallel", "parallel"),
                vmem_limit_bytes=vmem_limit,
            ),
            cost_estimate=cost,
        )(x, w, b)

    return pl.pallas_call(
        _expert_matmul_kernel,
        out_shape=jax.ShapeDtypeStruct((E, M, N), out_dtype),
        grid_spec=pltpu.PrefetchScalarGridSpec(
            num_scalar_prefetch=0,
            grid=(E, gm, gn, gk),
            in_specs=[
                pl.BlockSpec((None, tm, tk), lambda e, i, j, k: (e, i, k)),
                pl.BlockSpec((None, tk, tn), lambda e, i, j, k: (e, k, j)),
                pl.BlockSpec((None, 1, tn), lambda e, i, j, k: (e, 0, j)),
            ],
            out_specs=pl.BlockSpec(
                (None, tm, tn), lambda e, i, j, k: (e, i, j)
            ),
            scratch_shapes=[pltpu.VMEM((tm, tn), jnp.float32)],
        ),
        compiler_params=pltpu.CompilerParams(
            dimension_semantics=("parallel", "parallel", "parallel", "arbitrary"),
            vmem_limit_bytes=vmem_limit,
        ),
        cost_estimate=cost,
    )(x, w, b)


# ---------------------------------------------------------------------------
# JIT'd host wrapper: pad/cast x (weights are pre-staged), run, slice padding.
# ---------------------------------------------------------------------------
@partial(jax.jit, static_argnames=("n_out", "out_dtype"))
def _remote_expert_apply(x_stack, w_pad, b_pad, *, n_out, out_dtype):
    E, M, K = x_stack.shape
    _, K_pad, N_pad = w_pad.shape

    # --- M tiling: 16-aligned for bf16 sublane packing, up to 256-512 ---
    m16 = _round_up(M, _SUBLANE_BF16)
    if m16 <= 512:
        tm, M_pad = m16, m16
    else:
        tm = 256
        M_pad = _round_up(M, tm)

    # --- K tiling: single tile when it fits, else 512-deep (pre-padded) ---
    tk = K_pad if K_pad <= 1024 else 512

    # --- N tiling: 256-512 wide, MXU-aligned ---
    if N_pad <= 512:
        tn = N_pad
    else:
        tn = 512 if N_pad % 512 == 0 else 256
    # v7x has 2 TensorCores: if E and M/tm both collapse to 1, make sure the
    # N axis still yields >= 2 parallel tiles.
    if E == 1 and M_pad == tm and N_pad // tn == 1 and tn >= 256:
        tn //= 2

    x_p = jnp.pad(
        x_stack, ((0, 0), (0, M_pad - M), (0, K_pad - K))
    ).astype(jnp.bfloat16)

    y_p = _batched_expert_forward(
        x_p, w_pad, b_pad, tm=tm, tn=tn, tk=tk, out_dtype=out_dtype
    )
    return y_p[:, :M, :n_out]


# ---------------------------------------------------------------------------
# RemoteModule: Dict[str, Array] -> Dict[str, Array]
# ---------------------------------------------------------------------------
class RemoteModule:
    """JAX analogue of RemoteModule: the 'remote' expert is simulated locally
    with deterministic parameters; the matmul/bias compute runs in the Pallas
    kernel above.  Weights are stacked, padded, and cast to bf16 once at
    construction; keys with the same flattened row count are processed in a
    single batched pallas_call."""

    def __init__(self, module_id: str, hidden: int, key_names, seed: int = 0,
                 out_dtype=None):
        self.module_id = module_id
        self.hidden = hidden
        self.out_dtype = out_dtype  # None => follow input dtype; jnp.bfloat16 halves writeback
        self._key_order = tuple(key_names)
        self._key_index = {n: i for i, n in enumerate(self._key_order)}

        K_pad, N_pad = _padded_kn(hidden, hidden)
        self.params = {}
        w_list, b_list = [], []
        base_key = jax.random.PRNGKey(seed)
        for i, name in enumerate(self._key_order):
            kw, kb = jax.random.split(jax.random.fold_in(base_key, i))
            w = (
                jax.random.normal(kw, (hidden, hidden), jnp.float32)
                / jnp.sqrt(jnp.float32(hidden))
            )
            b = jax.random.normal(kb, (1, hidden), jnp.float32) * 0.01
            self.params[name] = (w, b)
            w_list.append(
                jnp.pad(w, ((0, K_pad - hidden), (0, N_pad - hidden))).astype(
                    jnp.bfloat16
                )
            )
            b_list.append(
                jnp.pad(b, ((0, 0), (0, N_pad - hidden))).astype(jnp.float32)
            )
        # Pre-staged once: (E, K_pad, N_pad) bf16 and (E, 1, N_pad) f32.
        self._w_stack = jnp.stack(w_list, axis=0)
        self._b_stack = jnp.stack(b_list, axis=0)

    def forward(self, x: dict) -> dict:
        # Mirrors _RemoteModuleCall.forward: collect inputs by key, run the
        # remote module, return a dict keyed identically.
        out = {}
        groups = {}
        for name, tensor in x.items():
            assert tensor.shape[-1] == self.hidden
            m = int(math.prod(tensor.shape[:-1])) if tensor.ndim > 1 else 1
            groups.setdefault(m, []).append(name)

        for m, names in groups.items():
            idx = [self._key_index[n] for n in names]
            if idx == list(range(len(self._key_order))):
                w_stack, b_stack = self._w_stack, self._b_stack
            else:
                sel = jnp.asarray(idx, jnp.int32)
                w_stack = jnp.take(self._w_stack, sel, axis=0)
                b_stack = jnp.take(self._b_stack, sel, axis=0)

            x_stack = jnp.stack(
                [x[n].reshape(m, self.hidden) for n in names], axis=0
            )
            out_dtype = (
                self.out_dtype if self.out_dtype is not None else x_stack.dtype
            )
            y_stack = _remote_expert_apply(
                x_stack, w_stack, b_stack, n_out=self.hidden, out_dtype=out_dtype
            )
            for e, n in enumerate(names):
                out[n] = y_stack[e].reshape(x[n].shape)
        return out

    def __call__(self, x: dict) -> dict:
        return self.forward(x)


if __name__ == "__main__":
    batch, seq, hidden = 2, 8, 32
    key = jax.random.PRNGKey(0)
    k1, k2 = jax.random.split(key)
    inputs = {
        "x": jax.random.normal(k1, (batch, seq, hidden), jnp.float32),
        "y": jax.random.normal(k2, (batch, seq, hidden), jnp.float32),
    }

    module = RemoteModule(
        module_id="expert.0", hidden=hidden, key_names=("x", "y")
    )
    result = module(inputs)
    result = jax.tree_util.tree_map(jax.block_until_ready, result)

    # Sanity check against a pure-JAX reference of the simulated expert
    # (same bf16 matmul / f32-accumulate numerics as the kernel).
    for name in ("x", "y"):
        w, b = module.params[name]
        x2d = inputs[name].reshape(-1, hidden)
        ref = (
            jnp.dot(
                x2d.astype(jnp.bfloat16),
                w.astype(jnp.bfloat16),
                preferred_element_type=jnp.float32,
            )
            + b
        ).reshape(inputs[name].shape)
        assert result[name].shape == inputs[name].shape
        assert result[name].dtype == inputs[name].dtype
        assert jnp.allclose(result[name], ref, atol=1e-3, rtol=1e-3)

    print("KERNEL_OK")
</pallas_src>

<mosaic_0001>
module attributes {stable_mosaic.version = 11 : i64} {
  func.func @_expert_matmul_k1_kernel(%arg0: i32, %arg1: i32, %arg2: i32, %arg3: memref<1x16x256xbf16, #tpu.memory_space<vmem>>, %arg4: memref<1x256x256xbf16, #tpu.memory_space<vmem>>, %arg5: memref<1x1x256xf32, #tpu.memory_space<vmem>>, %arg6: memref<1x16x256xf32, #tpu.memory_space<vmem>>) attributes {dimension_semantics = [#tpu.dimension_semantics<parallel>, #tpu.dimension_semantics<parallel>, #tpu.dimension_semantics<parallel>], iteration_bounds = array<i64: 2, 1, 1>, scalar_prefetch = 0 : i64, scratch_operands = 0 : i64, tpu.core_type = #tpu.core_type<tc>, window_params = [{transform_indices = @transform_0, window_bounds = array<i64: 1, 16, 256>}, {transform_indices = @transform_1, window_bounds = array<i64: 1, 256, 256>}, {transform_indices = @transform_2, window_bounds = array<i64: 1, 1, 256>}, {transform_indices = @transform_3, window_bounds = array<i64: 1, 16, 256>}]} {
    %c0 = arith.constant 0 : index
    %c0_0 = arith.constant 0 : index
    %c0_1 = arith.constant 0 : index
    %0 = vector.load %arg3[%c0, %c0_0, %c0_1] : memref<1x16x256xbf16, #tpu.memory_space<vmem>>, vector<1x16x256xbf16>
    %1 = vector.shape_cast %0 : vector<1x16x256xbf16> to vector<16x256xbf16>
    %c0_2 = arith.constant 0 : index
    %c0_3 = arith.constant 0 : index
    %c0_4 = arith.constant 0 : index
    %2 = vector.load %arg4[%c0_2, %c0_3, %c0_4] : memref<1x256x256xbf16, #tpu.memory_space<vmem>>, vector<1x256x256xbf16>
    %3 = vector.shape_cast %2 : vector<1x256x256xbf16> to vector<256x256xbf16>
    %cst = arith.constant dense<0.000000e+00> : vector<16x256xf32>
    %4 = tpu.matmul %1, %3, %cst {dimension_numbers = #tpu.dot_dimension_numbers<[1], [0], [0], [1], [0, 0, 1, 1], [], []>} : vector<16x256xbf16>, vector<256x256xbf16>, vector<16x256xf32> -> vector<16x256xf32>
    %c0_5 = arith.constant 0 : index
    %c0_6 = arith.constant 0 : index
    %c0_7 = arith.constant 0 : index
    %5 = vector.load %arg5[%c0_5, %c0_6, %c0_7] : memref<1x1x256xf32, #tpu.memory_space<vmem>>, vector<1x1x256xf32>
    %6 = vector.shape_cast %5 : vector<1x1x256xf32> to vector<1x256xf32>
    %7 = vector.broadcast %6 : vector<1x256xf32> to vector<16x256xf32>
    %8 = arith.addf %4, %7 : vector<16x256xf32>
    %c0_8 = arith.constant 0 : index
    %c0_9 = arith.constant 0 : index
    %c0_10 = arith.constant 0 : index
    %9 = vector.load %arg6[%c0_8, %c0_9, %c0_10] : memref<1x16x256xf32, #tpu.memory_space<vmem>>, vector<1x16x256xf32>
    %10 = vector.shape_cast %9 : vector<1x16x256xf32> to vector<16x256xf32>
    %11 = vector.shape_cast %8 : vector<16x256xf32> to vector<1x16x256xf32>
    tpu.vector_store %arg6[%c0_8, %c0_9, %c0_10], %11 {strides = array<i32>} : memref<1x16x256xf32, #tpu.memory_space<vmem>>, vector<1x16x256xf32>,
    return
  }
  func.func @transform_0(%arg0: i32, %arg1: i32, %arg2: i32) -> (i32, i32, i32) {
    %c0_i32 = arith.constant 0 : i32
    %c0_i32_0 = arith.constant 0 : i32
    return %arg0, %arg1, %c0_i32 : i32, i32, i32
  }
  func.func @transform_1(%arg0: i32, %arg1: i32, %arg2: i32) -> (i32, i32, i32) {
    %c0_i32 = arith.constant 0 : i32
    %c0_i32_0 = arith.constant 0 : i32
    return %arg0, %c0_i32, %arg2 : i32, i32, i32
  }
  func.func @transform_2(%arg0: i32, %arg1: i32, %arg2: i32) -> (i32, i32, i32) {
    %c0_i32 = arith.constant 0 : i32
    %c0_i32_0 = arith.constant 0 : i32
    return %arg0, %c0_i32, %arg2 : i32, i32, i32
  }
  func.func @transform_3(%arg0: i32, %arg1: i32, %arg2: i32) -> (i32, i32, i32) {
    %c0_i32 = arith.constant 0 : i32
    return %arg0, %arg1, %arg2 : i32, i32, i32
  }
}

</mosaic_0001>

<bundles_post_ra>
// kernel: _remote_expert_apply.1
= control target key start
LH: loop header
LB: loop body
LE: loop exit
PB: predicated region body
PF: predicated region fallthrough
CT: control target
= control target key end

     0   :  { %8 = vsyncpa [#allocation3], 0  ;;  %s1253_s0 = inlined_call_operand.vmem [shape: bf16[2,16,256], index: 0, kind: input, shape index: {}]   ;;  %s1254_s1 = inlined_call_operand.hbm [shape: bf16[2,256,256], index: 1, kind: input, shape index: {}]   ;;  %s1255_s2 = inlined_call_operand.vmem [shape: f32[2,1,256], index: 2, kind: input, shape index: {}]   ;;  %s1256_s3 = inlined_call_operand.vmem [shape: f32[2,16,256], index: 3, kind: output, shape index: {}]  }
   0x1   :  { %10 = vsyncpa [#allocation3 + $0x1], 0  ;;  %s1086_s12 = smov 0   ;;  %s1088_s13 = smov 0  }
   0x2   :  { %s1090_s14 = smov 0   ;;  %s1092_s15 = smov 0  }
   0x3   :  { %s1094_s16 = smov 0   ;;  %s1096_s17 = smov 0  }
   0x4 LB: > { %s736_s18 = sadd.s32 4294967295, %s1062_s17   ;;  %s35_s19 = sadd.s32 1, %s1058_s16  ;;  %s1062_s17 = sphi %s1096_s17, %s16_s17   ;;  %s1058_s16 = sphi %s1094_s16, %s1263_s16   ;;  %s1054_s15 = sphi %s1092_s15, %s1262_s15   ;;  %s1050_s14 = sphi %s1090_s14, %s1261_s14   ;;  %s1046_s13 = sphi %s1088_s13, %s1260_s13   ;;  %s1042_s12 = sphi %s1086_s12, %s1259_s12  }
   0x5   : > { %p37_p0 = scmp.ge.s32.totalorder %s35_s19, 2  ;;  %s72_s20 = sadd.s32 1, %s1050_s14 }
   0x6   : > { %p79_p1 = scmp.ne.s32.totalorder %s1050_s14, %s1046_s13  ;;  %p80_p2 = scmp.eq.s32.totalorder %s1062_s17, 0 }
   0x7   : > { %s1265_s19 = smov (%p37_p0, %s35_s19), 0  ;;  %p85_p4 = scmp.ne.s32.totalorder %s1046_s13, %s1042_s12 }
   0x8   : > { %p1122_p3 = por %p80_p2, %p79_p1  ;;  %s67_s22 = ssub.s32 %s1058_s16, %s1265_s19 }
   0x9   : > { %p86_p5 = scmp.eq.s32.totalorder %s736_s18, 0  ;;  %p70_p6 = scmp.eq.s32.totalorder %s67_s22, 0 }
   0xa   : > { %p931_p8 = scmp.lt.s32.totalorder %s1062_s17, 2  ;;  %s181_s25 = sand.u32 1, %s1050_s14  }
   0xb   : > { %p1129_p7 = por %p86_p5, %p85_p4  ;;  %s888_s26 = sshll.u32 %s1058_s16, 8 }
   0xc   : > { %s1135_s24 = scalar_select %p70_p6, %s1050_s14, %s72_s20  }
   0xd   : > { %s740_s27 = sshll.u32 %s181_s25, 8  ;;  %s192_s30 = scalar_lea.hbm %s1254_s1, %s888_s26 }
   0xe   : > { %s193_s4 = sshll.u32 %s192_s30, 4  ;;  %s185_s5 = scalar_lea.vmem [#allocation2], %s740_s27  ;;  %s194_s4 = int_to_ptr.hbm [resolvable:$true] %s193_s4 }
   0xf   : > { %s195_s6 = sshll.u32 %s185_s5, 4  ;;  %p928_p9 = pnand %p931_p8, %p1122_p3  ;;  %s196_s6 = int_to_ptr.vmem [resolvable:$true] %s195_s6 }
  0x10   : > { %p743_p10 = scmp.ge.s32.totalorder %s1062_s17, 1  ;;  %p215_p11 = scmp.lt.s32.totalorder %s1062_s17, 3 }
  0x11   : > { %s182_s7 = scalar_lea.sflag [#allocation3], %s181_s25  ;;  %s1064_s8 = smov 128  }
  0x12   : > { %s1065_s9 = smov 8   ;;  %p216_p12 = pnand %p743_p10, %p215_p11 }
  0x13   : > { %930 = dma.hbm_to_vmem [thread:$0]  (!%p928_p9), %s194_s4, 4096, %s196_s6, %s182_s7, %s1064_s8, %s1064_s8, %s1065_s9  }
  0x14   : > { %219 = sbr.rel (%p216_p12) target bundleno = 207 (0xcf), region = 32  ;;  %s221_s10 = sand.u32 (!%p216_p12), 1, %s1046_s13  }
  0x15   : > { %s744_s11 = sshll.u32 (!%p216_p12), %s221_s10, 8  ;;  %s222_s12 = scalar_lea.sflag (!%p216_p12), [#allocation3], %s221_s10 }
  0x16   : > { %s1147_s18 = scalar_lea.vmem (!%p216_p12), [#allocation2], %s744_s11 }
  0x19   : > { %1037 = dma.done.wait (%p1129_p7), %s222_s12, 4096  }
  0x1a   : > { %1039 = vsyncadd (%p1129_p7), %s222_s12, 4294963200  ;;  %v816_v0 = vld [vmem:[%s1147_s18 + $0x70] sm:$0xf]  ;;  %v908_v1 = vld [vmem:[%s1147_s18 + $0x74] sm:$0xf0]  ;;  %p277_p13 = scmp.lt.s32.totalorder %s1054_s15, 1 }
  0x1b   : > { %v880_v2 = vld [vmem:[%s1147_s18 + $0xf0] sm:$0xf]  ;;  %v817_v3 = vor.u32 %v908_v1, %v816_v0  ;;  %v924_v4 = vld [vmem:[%s1147_s18 + $0xf4] sm:$0xf0]  ;;  %v907_v5 = vld [vmem:[%s1147_s18 + $0x74] sm:$0xf] }
  0x1c   : > { %v818_v6 = vld [vmem:[%s1147_s18 + $0x78] sm:$0xf0]  ;;  %v881_v7 = vor.u32 %v924_v4, %v880_v2  ;;  %v923_v9 = vld [vmem:[%s1147_s18 + $0xf4] sm:$0xf]  ;;  %v808_v11 = vld [vmem:[%s1147_s18 + $0x60] sm:$0xf] }
  0x1d   : > { %v821_v8 = vor.u32 %v907_v5, %v818_v6  ;;  %v882_v10 = vld [vmem:[%s1147_s18 + $0xf8] sm:$0xf0]  ;;  %523 = vmatpush.bf16.msra.mxu0 %v817_v3  ;;  %v906_v13 = vld [vmem:[%s1147_s18 + $0x64] sm:$0xf0]  ;;  %v872_v14 = vld [vmem:[%s1147_s18 + $0xe0] sm:$0xf] }
  0x1e   : > { %v885_v12 = vor.u32 %v923_v9, %v882_v10  ;;  %v922_v15 = vld [vmem:[%s1147_s18 + $0xe4] sm:$0xf0]  ;;  %537 = vmatpush.bf16.msra.mxu1 %v881_v7  ;;  %v809_v16 = vor.u32 %v906_v13, %v808_v11  ;;  %v905_v18 = vld [vmem:[%s1147_s18 + $0x64] sm:$0xf]  ;;  %v810_v19 = vld [vmem:[%s1147_s18 + $0x68] sm:$0xf0] }
  0x1f   : > { %551 = vmatpush.bf16.msra.mxu2 %v821_v8  ;;  %v873_v17 = vor.u32 %v922_v15, %v872_v14  ;;  %v921_v20 = vld [vmem:[%s1147_s18 + $0xe4] sm:$0xf]  ;;  %v813_v21 = vor.u32 %v905_v18, %v810_v19  ;;  %v874_v22 = vld [vmem:[%s1147_s18 + $0xe8] sm:$0xf0]  ;;  %v800_v23 = vld [vmem:[%s1147_s18 + $0x50] sm:$0xf] }
  0x20   : > { %565 = vmatpush.bf16.msra.mxu3 %v885_v12  ;;  %v904_v24 = vld [vmem:[%s1147_s18 + $0x54] sm:$0xf0]  ;;  %v877_v25 = vor.u32 %v921_v20, %v874_v22  ;;  %v864_v26 = vld [vmem:[%s1147_s18 + $0xd0] sm:$0xf]  ;;  %v903_v28 = vld [vmem:[%s1147_s18 + $0x54] sm:$0xf] }
  0x21   : > { %v920_v27 = vld [vmem:[%s1147_s18 + $0xd4] sm:$0xf0]  ;;  %524 = vmatpush.bf16.msra.mxu0 %v809_v16  ;;  %v801_v29 = vor.u32 %v904_v24, %v800_v23  ;;  %v802_v30 = vld [vmem:[%s1147_s18 + $0x58] sm:$0xf0]  ;;  %v919_v31 = vld [vmem:[%s1147_s18 + $0xd4] sm:$0xf] }
  0x22   : > { %v866_v32 = vld [vmem:[%s1147_s18 + $0xd8] sm:$0xf0]  ;;  %538 = vmatpush.bf16.msra.mxu1 %v873_v17  ;;  %v865_v33 = vor.u32 %v920_v27, %v864_v26  ;;  %v805_v34 = vor.u32 %v903_v28, %v802_v30  ;;  %v792_v35 = vld [vmem:[%s1147_s18 + $0x40] sm:$0xf]  ;;  %v902_v36 = vld [vmem:[%s1147_s18 + $0x44] sm:$0xf0] }
  0x23   : > { %552 = vmatpush.bf16.msra.mxu2 %v813_v21  ;;  %v856_v37 = vld [vmem:[%s1147_s18 + $0xc0] sm:$0xf]  ;;  %v869_v38 = vor.u32 %v919_v31, %v866_v32  ;;  %v918_v39 = vld [vmem:[%s1147_s18 + $0xc4] sm:$0xf0]  ;;  %v901_v40 = vld [vmem:[%s1147_s18 + $0x44] sm:$0xf]  ;;  %v793_v44 = vor.u32 %v902_v36, %v792_v35 }
  0x24   : > { %566 = vmatpush.bf16.msra.mxu3 %v877_v25  ;;  %v794_v41 = vld [vmem:[%s1147_s18 + $0x48] sm:$0xf0]  ;;  %v917_v42 = vld [vmem:[%s1147_s18 + $0xc4] sm:$0xf]  ;;  %v857_v45 = vor.u32 %v918_v39, %v856_v37  ;;  %v784_v47 = vld [vmem:[%s1147_s18 + $0x30] sm:$0xf] }
  0x25   : > { %v858_v43 = vld [vmem:[%s1147_s18 + $0xc8] sm:$0xf0]  ;;  %525 = vmatpush.bf16.msra.mxu0 %v801_v29  ;;  %v797_v46 = vor.u32 %v901_v40, %v794_v41  ;;  %v900_v48 = vld [vmem:[%s1147_s18 + $0x34] sm:$0xf0]  ;;  %v848_v49 = vld [vmem:[%s1147_s18 + $0xb0] sm:$0xf] }
  0x26   : > { %539 = vmatpush.bf16.msra.mxu1 %v865_v33  ;;  %v861_v50 = vor.u32 %v917_v42, %v858_v43  ;;  %v916_v51 = vld [vmem:[%s1147_s18 + $0xb4] sm:$0xf0]  ;;  %v899_v52 = vld [vmem:[%s1147_s18 + $0x34] sm:$0xf]  ;;  %v786_v53 = vld [vmem:[%s1147_s18 + $0x38] sm:$0xf0]  ;;  %v785_v56 = vor.u32 %v900_v48, %v784_v47 }
  0x27   : > { %553 = vmatpush.bf16.msra.mxu2 %v805_v34  ;;  %v915_v54 = vld [vmem:[%s1147_s18 + $0xb4] sm:$0xf]  ;;  %v850_v55 = vld [vmem:[%s1147_s18 + $0xb8] sm:$0xf0]  ;;  %s1267_s15 = smov (!%p277_p13, %s1054_s15), 1  ;;  %v849_v57 = vor.u32 %v916_v51, %v848_v49  ;;  %v789_v58 = vor.u32 %v899_v52, %v786_v53 }
  0x28   : > { %567 = vmatpush.bf16.msra.mxu3 %v869_v38  ;;  %v776_v59 = vld [vmem:[%s1147_s18 + $0x20] sm:$0xf]  ;;  %v898_v60 = vld [vmem:[%s1147_s18 + $0x24] sm:$0xf0]  ;;  %v853_v62 = vor.u32 %v915_v54, %v850_v55  ;;  %v897_v0 = vld [vmem:[%s1147_s18 + $0x24] sm:$0xf] }
  0x29   : > { %526 = vmatpush.bf16.msra.mxu0 %v793_v44  ;;  %v840_v61 = vld [vmem:[%s1147_s18 + $0xa0] sm:$0xf]  ;;  %v914_v63 = vld [vmem:[%s1147_s18 + $0xa4] sm:$0xf0]  ;;  %v778_v1 = vld [vmem:[%s1147_s18 + $0x28] sm:$0xf0]  ;;  %v777_v4 = vor.u32 %v898_v60, %v776_v59 }
  0x2a   : > { %540 = vmatpush.bf16.msra.mxu1 %v857_v45  ;;  %v913_v2 = vld [vmem:[%s1147_s18 + $0xa4] sm:$0xf]  ;;  %v842_v3 = vld [vmem:[%s1147_s18 + $0xa8] sm:$0xf0]  ;;  %s889_s20 = sshll.u32 %s1267_s15, 4  ;;  %v841_v5 = vor.u32 %v914_v63, %v840_v61  ;;  %v781_v6 = vor.u32 %v897_v0, %v778_v1  ;;  %s747_s25 = sshll.u32 %s1267_s15, 1 }
  0x2b   : > { %554 = vmatpush.bf16.msra.mxu2 %v797_v46  ;;  %v768_v7 = vld [vmem:[%s1147_s18 + $0x10] sm:$0xf]  ;;  %v896_v8 = vld [vmem:[%s1147_s18 + $0x14] sm:$0xf0]  ;;  %v845_v10 = vor.u32 %v913_v2, %v842_v3  ;;  %v895_v12 = vld [vmem:[%s1147_s18 + $0x14] sm:$0xf]  ;;  %s285_s23 = scalar_lea.vmem %s1253_s0, %s889_s20  ;;  %s295_s28 = scalar_lea.vmem %s1255_s2, %s747_s25 }
  0x2c   : > { %568 = vmatpush.bf16.msra.mxu3 %v861_v50  ;;  %v832_v9 = vld [vmem:[%s1147_s18 + $0x90] sm:$0xf]  ;;  %v912_v11 = vld [vmem:[%s1147_s18 + $0x94] sm:$0xf0]  ;;  %v770_v13 = vld [vmem:[%s1147_s18 + $0x18] sm:$0xf0]  ;;  %v769_v16 = vor.u32 %v896_v8, %v768_v7 }
  0x2d   : > { %527 = vmatpush.bf16.msra.mxu0 %v785_v56  ;;  %v911_v14 = vld [vmem:[%s1147_s18 + $0x94] sm:$0xf]  ;;  %v834_v15 = vld [vmem:[%s1147_s18 + $0x98] sm:$0xf0]  ;;  %v833_v17 = vor.u32 %v912_v11, %v832_v9  ;;  %v773_v18 = vor.u32 %v895_v12, %v770_v13  ;;  %v760_v19 = vld [vmem:[%s1147_s18] sm:$0xf] }
  0x2e   : > { %541 = vmatpush.bf16.msra.mxu1 %v849_v57  ;;  %v894_v20 = vld [vmem:[%s1147_s18 + $0x4] sm:$0xf0]  ;;  %v824_v21 = vld [vmem:[%s1147_s18 + $0x80] sm:$0xf]  ;;  %v837_v22 = vor.u32 %v911_v14, %v834_v15  ;;  %v893_v24 = vld [vmem:[%s1147_s18 + $0x4] sm:$0xf] }
  0x2f   : > { %555 = vmatpush.bf16.msra.mxu2 %v789_v58  ;;  %v910_v23 = vld [vmem:[%s1147_s18 + $0x84] sm:$0xf0]  ;;  %v762_v25 = vld [vmem:[%s1147_s18 + $0x8] sm:$0xf0]  ;;  %v909_v26 = vld [vmem:[%s1147_s18 + $0x84] sm:$0xf]  ;;  %v761_v28 = vor.u32 %v894_v20, %v760_v19 }
  0x30   : > { %569 = vmatpush.bf16.msra.mxu3 %v853_v62  ;;  %v826_v27 = vld [vmem:[%s1147_s18 + $0x88] sm:$0xf0]  ;;  %v752_v29 = vld [vmem:[%s285_s23] sm:$0xf]  ;;  %v892_v30 = vld [vmem:[%s285_s23 + $0x4] sm:$0xf0]  ;;  %v825_v31 = vor.u32 %v910_v23, %v824_v21  ;;  %v765_v32 = vor.u32 %v893_v24, %v762_v25 }
  0x31   : > { %528 = vmatpush.bf16.msra.mxu0 %v777_v4  ;;  %v891_v33 = vld [vmem:[%s285_s23 + $0x4] sm:$0xf]  ;;  %v754_v34 = vld [vmem:[%s285_s23 + $0x8] sm:$0xf0]  ;;  %v829_v35 = vor.u32 %v909_v26, %v826_v27  ;;  %v753_v36 = vor.u32 %v892_v30, %v752_v29  ;;  %v347_v38 = vld [vmem:[%s295_s28] sm:$0x3] }
  0x32   : > { %542 = vmatpush.bf16.msra.mxu1 %v841_v5  ;;  %v757_v37 = vor.u32 %v891_v33, %v754_v34  ;;  %v349_v39 = vperm.slane %v347_v38, 0  ;;  %s890_s29 = sshll.u32 %s1267_s15, 5  ;;  %v350_v44 = vperm.slane %v347_v38, 1 }
  0x33   : > { %556 = vmatpush.bf16.msra.mxu2 %v781_v6  ;;  %s310_s5 = scalar_lea.vmem %s1256_s3, %s890_s29 }
  0x34   : > { %570 = vmatpush.bf16.msra.mxu3 %v845_v10 }
  0x35   : > { %529 = vmatpush.bf16.msra.mxu0 %v769_v16 }
  0x36   : > { %543 = vmatpush.bf16.msra.mxu1 %v833_v17 }
  0x37   : > { %557 = vmatpush.bf16.msra.mxu2 %v773_v18 }
  0x38   : > { %571 = vmatpush.bf16.msra.mxu3 %v837_v22 }
  0x39   : > { %530 = vmatpush.bf16.msra.mxu0 %v761_v28 }
  0x3a   : > { %544 = vmatpush.bf16.msra.mxu1 %v825_v31 }
  0x3b   : > { %558 = vmatpush.bf16.msra.mxu2 %v765_v32 }
  0x3c   : > { %572 = vmatpush.bf16.msra.mxu3 %v829_v35  ;;  %531 = vmatmul.bf16.vlgmr.msra.gmra.mxu0 %v753_v36 }
  0x3d   : > { %545 = vmatmul.bf16.vlgmr.msra.gmra.mxu1 %v757_v37 }
  0x3e   : > { %559 = vmatmul.bf16.vlgmr.msra.gmra.mxu2 %v753_v36 }
  0x3f   : > { %573 = vmatmul.bf16.vlgmr.msra.gmra.mxu3 %v757_v37 }
  0xb9   : > { %v532_v40 = vpop.f32.mrf.mxu0 }
  0xba   : > { %v533_v41 = vadd.f32 %v532_v40, %v349_v39  ;;  %v546_v42 = vpop.f32.mrf.mxu1 }
  0xbc   : > { %v547_v43 = vadd.f32 %v546_v42, %v533_v41 }
  0xbe   : > { %579 = vst [vmem:[%s310_s5] sm:$0xff] %v547_v43 }
  0xc1   : > { %v560_v45 = vpop.f32.mrf.mxu2  ;;  %v534_v48 = vpop.f32.mrf.mxu0 }
  0xc2   : > { %v561_v46 = vadd.f32 %v560_v45, %v350_v44  ;;  %v574_v47 = vpop.f32.mrf.mxu3  ;;  %v535_v49 = vadd.f32 %v534_v48, %v349_v39  ;;  %v548_v51 = vpop.f32.mrf.mxu1 }
  0xc4   : > { %v575_v50 = vadd.f32 %v574_v47, %v561_v46  ;;  %v549_v52 = vadd.f32 %v548_v51, %v535_v49 }
  0xc6   : > { %580 = vst [vmem:[%s310_s5 + $0x8] sm:$0xff] %v575_v50 }
  0xc7   : > { %581 = vst [vmem:[%s310_s5 + $0x10] sm:$0xff] %v549_v52 }
  0xc9   : > { %v562_v53 = vpop.f32.mrf.mxu2 }
  0xca   : > { %v563_v54 = vadd.f32 %v562_v53, %v350_v44  ;;  %v576_v55 = vpop.f32.mrf.mxu3 }
  0xcc   : > { %v577_v56 = vadd.f32 %v576_v55, %v563_v54 }
  0xce   : > { %582 = vst [vmem:[%s310_s5 + $0x18] sm:$0xff] %v577_v56 }
  0xcf PF: > { %s16_s17 = sadd.s32 1, %s1062_s17   ;;  %s1259_s12 = smov %s1046_s13 }
  0xd0   : > { %p13_p0 = scmp.ge.s32.totalorder %s16_s17, 4   ;;  %s1260_s13 = smov %s1050_s14 }
  0xd1   : > { %s1261_s14 = smov %s1135_s24  ;;  %s1262_s15 = smov %s1058_s16 }
  0xd2   : > { %s1263_s16 = smov %s1265_s19  ;;  %15 = sbr.rel (!%p13_p0) target bundleno = 4 (0x4), region = 78 }
  0xd7   :  { %624 = vsyncpa [#allocation3], 1 }
  0xd8   :  { %626 = vsyncpa [#allocation3 + $0x1], 1 }

</bundles_post_ra>
